<compile_context>
chip_gen: v5e
topology: v5e:2x2
jax: 0.10.0
libtpu: 0.0.40
codegen_flags: <defaults>
</compile_context>

<pallas_src>
import functools
import inspect

import jax
import jax.numpy as jnp
from jax.experimental import pallas as pl
from jax.experimental.pallas import tpu as pltpu

LEAKY_SLOPE = 0.01
BN_EPS = 1e-5
LANE = 128
SUBLANE = 8


def _round_up(x, m):
    return (x + m - 1) // m * m


# ---------------------------------------------------------------------------
# Fused kernel: all layers in one body, activation resident across layers.
# ---------------------------------------------------------------------------
def _fused_mlp_kernel(x_ref, w_ref, b_ref, out_ref, *,
                      layer_flags, kpad, hpad, npad):
    # x_ref:   (bt, kpad)        bf16 batch tile of the (padded) input
    # w_ref:   (L, dpad, dpad)   bf16 BN-folded, zero-padded weights (in, out)
    # b_ref:   (L, 1, dpad)      f32 BN-folded, zero-padded biases
    # out_ref: (bt, npad)        f32
    n_layers = len(layer_flags)
    x_lhs = x_ref[...]          # bf16 operand for the next matmul
    x_res = None                # f32 running activation (residual path)
    for li, (use_act, residual) in enumerate(layer_flags):
        k_in = kpad if li == 0 else hpad
        n_out = npad if li == n_layers - 1 else hpad
        w = w_ref[li, :k_in, :n_out]                 # static 128-aligned slice
        y = jnp.dot(x_lhs, w, preferred_element_type=jnp.float32)
        y = y + b_ref[li, :, :n_out]
        if use_act:
            y = jnp.maximum(y, LEAKY_SLOPE * y)      # LeakyReLU, 2 VALU ops
        if residual:
            y = y + x_res                            # residual stays f32
        x_res = y
        x_lhs = y.astype(jnp.bfloat16)
    out_ref[...] = x_res


def _supports_single_buffering():
    if not hasattr(pl, "Buffered"):
        return False
    try:
        return "pipeline_mode" in inspect.signature(pl.BlockSpec).parameters
    except (TypeError, ValueError):
        return False


def _vmem_limit_bytes(bt, kpad, npad, dpad, n_layers, single_buffer_weights):
    w_buf = 1 if single_buffer_weights else 2
    w_bytes = w_buf * n_layers * dpad * dpad * 2     # bf16 weight slab
    b_bytes = w_buf * n_layers * dpad * 4            # f32 bias slab
    io_bytes = 2 * bt * kpad * 2 + 2 * bt * npad * 4  # double-buffered x / out
    budget = w_bytes + b_bytes + io_bytes
    budget = int(budget * 1.25) + (8 << 20)          # headroom: activations, scratch
    return int(min(max(budget, 32 << 20), 112 << 20))


def _fused_mlp_pallas(x_pad, w_slab, b_slab, layer_flags, kpad, hpad, npad,
                      batch_tile, *, single_buffer_weights):
    bsz_pad = x_pad.shape[0]
    n_layers, dpad, _ = w_slab.shape
    kern = functools.partial(_fused_mlp_kernel, layer_flags=tuple(layer_flags),
                             kpad=kpad, hpad=hpad, npad=npad)

    const_kwargs = {}
    if single_buffer_weights:
        const_kwargs["pipeline_mode"] = pl.Buffered(1)
    w_spec = pl.BlockSpec((n_layers, dpad, dpad), lambda i: (0, 0, 0),
                          **const_kwargs)
    b_spec = pl.BlockSpec((n_layers, 1, dpad), lambda i: (0, 0, 0),
                          **const_kwargs)

    vmem_limit = _vmem_limit_bytes(batch_tile, kpad, npad, dpad, n_layers,
                                   single_buffer_weights)
    return pl.pallas_call(
        kern,
        out_shape=jax.ShapeDtypeStruct((bsz_pad, npad), jnp.float32),
        grid_spec=pltpu.PrefetchScalarGridSpec(
            num_scalar_prefetch=0,
            grid=(bsz_pad // batch_tile,),
            in_specs=[
                pl.BlockSpec((batch_tile, kpad), lambda i: (i, 0)),  # x tile
                w_spec,                                              # W slab
                b_spec,                                              # b slab
            ],
            out_specs=pl.BlockSpec((batch_tile, npad), lambda i: (i, 0)),
        ),
        compiler_params=pltpu.CompilerParams(
            dimension_semantics=("parallel",),
            vmem_limit_bytes=vmem_limit),
    )(x_pad, w_slab, b_slab)


# ---------------------------------------------------------------------------
# Host-side parameter prep: BN fold + lane padding + per-layer static flags.
# ---------------------------------------------------------------------------
def _fold_and_pad_params(params, *, use_batch_norm, use_activation,
                         last_layer_activation, last_layer_residual):
    n_total = len(params)
    n_input = params[0]["w"].shape[0]
    n_output = params[-1]["w"].shape[1]
    hidden = [p["w"].shape[1] for p in params[:-1]]
    kpad = _round_up(n_input, LANE)
    npad = _round_up(n_output, LANE)
    hpad = _round_up(max(hidden), LANE) if hidden else npad
    dpad = max(kpad, hpad, npad)

    w_slab, b_slab, layer_flags = [], [], []
    for i, p in enumerate(params):
        is_last = i == n_total - 1
        skip_activation = (not last_layer_activation) and is_last
        use_bn_i = use_batch_norm and not skip_activation
        use_act_i = use_activation and not skip_activation
        residual = not (i == 0 or (is_last and not last_layer_residual))

        w, b = p["w"], p["b"]                     # w: (d_in, d_out), b: (1, d_out)
        if use_bn_i:
            scale = p["gamma"] * jax.lax.rsqrt(p["var"] + BN_EPS)   # (1, d_out)
            w_f = w * scale
            b_f = (b - p["mean"]) * scale + p["beta"]
        else:
            w_f, b_f = w, b

        d_in, d_out = w.shape
        w_p = jnp.zeros((dpad, dpad), jnp.bfloat16).at[:d_in, :d_out].set(
            w_f.astype(jnp.bfloat16))
        b_p = jnp.zeros((1, dpad), jnp.float32).at[:, :d_out].set(
            b_f.astype(jnp.float32))
        w_slab.append(w_p)
        b_slab.append(b_p)
        layer_flags.append((use_act_i, residual))

    return (jnp.stack(w_slab), jnp.stack(b_slab), tuple(layer_flags),
            kpad, hpad, npad)


def _choose_batch_tile(bsz, hpad):
    # Width-aware cap: large tiles amortize the ~0.35us/grid-step overhead and
    # drive the HBM roofline for narrow nets; cap for very wide nets to bound
    # activation residency / load-store pressure.
    if hpad <= 512:
        cap = 512
    elif hpad <= 1024:
        cap = 128
    else:
        cap = 64
    bsz_up = _round_up(bsz, SUBLANE)
    if bsz_up <= cap:
        # Split into >=2 grid steps for larger batches so a 2-TC chip (v7x)
        # can use both cores; negligible cost on 1-TC chips.
        if bsz_up >= 128:
            return _round_up((bsz_up + 1) // 2, SUBLANE)
        return bsz_up
    # Prefer the largest tile whose zero-padding waste stays small; otherwise
    # fall back to the minimum-waste tile.
    max_waste = max(bsz // 16, SUBLANE)
    best_bt, best_padded = SUBLANE, _round_up(bsz, SUBLANE)
    for bt in range(cap, SUBLANE - 1, -SUBLANE):
        padded = _round_up(bsz, bt)
        if padded - bsz <= max_waste:
            return bt
        if padded < best_padded:
            best_bt, best_padded = bt, padded
    return best_bt


def residual_mlp_forward(x, params, *, use_batch_norm=True, use_activation=True,
                         last_layer_activation=True, last_layer_residual=False):
    bsz, n_in = x.shape
    n_out = params[-1]["w"].shape[1]
    n_hidden = params[0]["w"].shape[1]
    # Mirror the PyTorch module's constructor assertion.
    assert (not last_layer_residual) or (n_out == n_hidden), (
        "last_layer_residual requires n_output == n_hidden")

    w_slab, b_slab, layer_flags, kpad, hpad, npad = _fold_and_pad_params(
        params, use_batch_norm=use_batch_norm, use_activation=use_activation,
        last_layer_activation=last_layer_activation,
        last_layer_residual=last_layer_residual)

    bt = _choose_batch_tile(bsz, hpad)
    bsz_pad = _round_up(bsz, bt)

    x_pad = jnp.zeros((bsz_pad, kpad), jnp.bfloat16).at[:bsz, :n_in].set(
        x.astype(jnp.bfloat16))

    want_single = _supports_single_buffering()
    try:
        out_pad = _fused_mlp_pallas(x_pad, w_slab, b_slab, layer_flags,
                                    kpad, hpad, npad, bt,
                                    single_buffer_weights=want_single)
    except Exception:
        if not want_single:
            raise
        # Fallback if pipeline_mode=pl.Buffered(1) is not supported by this
        # JAX/Mosaic version: identical kernel, default double buffering.
        out_pad = _fused_mlp_pallas(x_pad, w_slab, b_slab, layer_flags,
                                    kpad, hpad, npad, bt,
                                    single_buffer_weights=False)
    return out_pad[:bsz, :n_out]


# ---------------------------------------------------------------------------
# Parameter init (mirrors the PyTorch module's shapes) + pure-JAX reference.
# ---------------------------------------------------------------------------
def init_residual_mlp_params(key, n_input, n_output, n_layers, n_hidden):
    layer_dims = [n_input] + n_layers * [n_hidden] + [n_output]
    params = []
    for i in range(1, len(layer_dims)):
        d_in, d_out = layer_dims[i - 1], layer_dims[i]
        key, kw, kb, km, kv = jax.random.split(key, 5)
        bound = 1.0 / jnp.sqrt(d_in)
        # weight stored pre-transposed as (in, out)
        w = jax.random.uniform(kw, (d_in, d_out), jnp.float32, -bound, bound)
        b = jax.random.uniform(kb, (1, d_out), jnp.float32, -bound, bound)
        gamma = jnp.ones((1, d_out), jnp.float32)
        beta = jnp.zeros((1, d_out), jnp.float32)
        mean = 0.1 * jax.random.normal(km, (1, d_out), jnp.float32)
        var = 1.0 + 0.1 * jax.random.uniform(kv, (1, d_out), jnp.float32)
        params.append(dict(w=w, b=b, gamma=gamma, beta=beta, mean=mean, var=var))
    return params


def residual_mlp_reference(x, params, *, use_batch_norm=True, use_activation=True,
                           last_layer_activation=True, last_layer_residual=False):
    n_total = len(params)
    for i, p in enumerate(params):
        is_last = i == n_total - 1
        skip_activation = (not last_layer_activation) and is_last
        y = x @ p["w"] + p["b"]
        if use_batch_norm and not skip_activation:
            y = (y - p["mean"]) / jnp.sqrt(p["var"] + BN_EPS) * p["gamma"] + p["beta"]
        if use_activation and not skip_activation:
            y = jnp.where(y >= 0, y, LEAKY_SLOPE * y)
        if i == 0 or (is_last and not last_layer_residual):
            x = y
        else:
            x = y + x
    return x


if __name__ == "__main__":
    # ResidualMLP(n_input=16, n_output=32, n_layers=2, n_hidden=32,
    #             use_batch_norm=True, activation_fn=LeakyReLU,
    #             use_activation=True, last_layer_activation=True,
    #             last_layer_residual=False)
    n_input, n_output, n_layers, n_hidden = 16, 32, 2, 32
    batch = 8

    key = jax.random.PRNGKey(0)
    kx, kp = jax.random.split(key)
    x = jax.random.normal(kx, (batch, n_input), jnp.float32)
    params = init_residual_mlp_params(kp, n_input, n_output, n_layers, n_hidden)

    # Config 1: default flags. (bf16 weights/operands -> relaxed tolerance vs f32 ref.)
    out = residual_mlp_forward(x, params)
    out = jax.block_until_ready(out)
    ref = residual_mlp_reference(x, params)
    assert out.shape == (batch, n_output), out.shape
    assert jnp.allclose(out, ref, atol=5e-2, rtol=5e-2), (
        float(jnp.max(jnp.abs(out - ref))))

    # Config 2: exercise last_layer_residual / skipped last activation+BN.
    out2 = residual_mlp_forward(x, params, last_layer_activation=False,
                                last_layer_residual=True)
    out2 = jax.block_until_ready(out2)
    ref2 = residual_mlp_reference(x, params, last_layer_activation=False,
                                  last_layer_residual=True)
    assert jnp.allclose(out2, ref2, atol=5e-2, rtol=5e-2), (
        float(jnp.max(jnp.abs(out2 - ref2))))

    print("KERNEL_OK")
</pallas_src>

<mosaic_0001>
module attributes {stable_mosaic.version = 11 : i64} {
  func.func @_fused_mlp_kernel(%arg0: i32, %arg1: memref<8x128xbf16, #tpu.memory_space<vmem>>, %arg2: memref<3x128x128xbf16, #tpu.memory_space<vmem>>, %arg3: memref<3x1x128xf32, #tpu.memory_space<vmem>>, %arg4: memref<8x128xf32, #tpu.memory_space<vmem>>) attributes {dimension_semantics = [#tpu.dimension_semantics<parallel>], iteration_bounds = array<i64: 1>, scalar_prefetch = 0 : i64, scratch_operands = 0 : i64, tpu.core_type = #tpu.core_type<tc>, window_params = [{transform_indices = @transform_0, window_bounds = array<i64: 8, 128>}, {pipeline_mode = #tpu.pipeline_mode<synchronous>, transform_indices = @transform_1, window_bounds = array<i64: 3, 128, 128>}, {pipeline_mode = #tpu.pipeline_mode<synchronous>, transform_indices = @transform_2, window_bounds = array<i64: 3, 1, 128>}, {transform_indices = @transform_3, window_bounds = array<i64: 8, 128>}]} {
    %c0 = arith.constant 0 : index
    %c0_0 = arith.constant 0 : index
    %0 = vector.load %arg1[%c0, %c0_0] : memref<8x128xbf16, #tpu.memory_space<vmem>>, vector<8x128xbf16>
    %c0_1 = arith.constant 0 : index
    %c0_2 = arith.constant 0 : index
    %c0_3 = arith.constant 0 : index
    %1 = vector.load %arg2[%c0_1, %c0_2, %c0_3] : memref<3x128x128xbf16, #tpu.memory_space<vmem>>, vector<1x128x128xbf16>
    %2 = vector.shape_cast %1 : vector<1x128x128xbf16> to vector<128x128xbf16>
    %cst = arith.constant dense<0.000000e+00> : vector<8x128xf32>
    %3 = tpu.matmul %0, %2, %cst {dimension_numbers = #tpu.dot_dimension_numbers<[1], [0], [0], [1], [0, 0, 1, 1], [], []>} : vector<8x128xbf16>, vector<128x128xbf16>, vector<8x128xf32> -> vector<8x128xf32>
    %c0_4 = arith.constant 0 : index
    %c0_5 = arith.constant 0 : index
    %c0_6 = arith.constant 0 : index
    %4 = vector.load %arg3[%c0_4, %c0_5, %c0_6] : memref<3x1x128xf32, #tpu.memory_space<vmem>>, vector<1x1x128xf32>
    %5 = vector.shape_cast %4 : vector<1x1x128xf32> to vector<1x128xf32>
    %6 = vector.broadcast %5 : vector<1x128xf32> to vector<8x128xf32>
    %7 = arith.addf %3, %6 : vector<8x128xf32>
    %cst_7 = arith.constant 0.00999999977 : f32
    %8 = vector.broadcast %cst_7 : f32 to vector<8x128xf32>
    %9 = arith.mulf %8, %7 : vector<8x128xf32>
    %10 = arith.maximumf %7, %9 : vector<8x128xf32>
    %11 = arith.truncf %10 : vector<8x128xf32> to vector<8x128xbf16>
    %c1 = arith.constant 1 : index
    %c0_8 = arith.constant 0 : index
    %c0_9 = arith.constant 0 : index
    %12 = vector.load %arg2[%c1, %c0_8, %c0_9] : memref<3x128x128xbf16, #tpu.memory_space<vmem>>, vector<1x128x128xbf16>
    %13 = vector.shape_cast %12 : vector<1x128x128xbf16> to vector<128x128xbf16>
    %cst_10 = arith.constant dense<0.000000e+00> : vector<8x128xf32>
    %14 = tpu.matmul %11, %13, %cst_10 {dimension_numbers = #tpu.dot_dimension_numbers<[1], [0], [0], [1], [0, 0, 1, 1], [], []>} : vector<8x128xbf16>, vector<128x128xbf16>, vector<8x128xf32> -> vector<8x128xf32>
    %c1_11 = arith.constant 1 : index
    %c0_12 = arith.constant 0 : index
    %c0_13 = arith.constant 0 : index
    %15 = vector.load %arg3[%c1_11, %c0_12, %c0_13] : memref<3x1x128xf32, #tpu.memory_space<vmem>>, vector<1x1x128xf32>
    %16 = vector.shape_cast %15 : vector<1x1x128xf32> to vector<1x128xf32>
    %17 = vector.broadcast %16 : vector<1x128xf32> to vector<8x128xf32>
    %18 = arith.addf %14, %17 : vector<8x128xf32>
    %cst_14 = arith.constant 0.00999999977 : f32
    %19 = vector.broadcast %cst_14 : f32 to vector<8x128xf32>
    %20 = arith.mulf %19, %18 : vector<8x128xf32>
    %21 = arith.maximumf %18, %20 : vector<8x128xf32>
    %22 = arith.addf %21, %10 : vector<8x128xf32>
    %23 = arith.truncf %22 : vector<8x128xf32> to vector<8x128xbf16>
    %c2 = arith.constant 2 : index
    %c0_15 = arith.constant 0 : index
    %c0_16 = arith.constant 0 : index
    %24 = vector.load %arg2[%c2, %c0_15, %c0_16] : memref<3x128x128xbf16, #tpu.memory_space<vmem>>, vector<1x128x128xbf16>
    %25 = vector.shape_cast %24 : vector<1x128x128xbf16> to vector<128x128xbf16>
    %cst_17 = arith.constant dense<0.000000e+00> : vector<8x128xf32>
    %26 = tpu.matmul %23, %25, %cst_17 {dimension_numbers = #tpu.dot_dimension_numbers<[1], [0], [0], [1], [0, 0, 1, 1], [], []>} : vector<8x128xbf16>, vector<128x128xbf16>, vector<8x128xf32> -> vector<8x128xf32>
    %c2_18 = arith.constant 2 : index
    %c0_19 = arith.constant 0 : index
    %c0_20 = arith.constant 0 : index
    %27 = vector.load %arg3[%c2_18, %c0_19, %c0_20] : memref<3x1x128xf32, #tpu.memory_space<vmem>>, vector<1x1x128xf32>
    %28 = vector.shape_cast %27 : vector<1x1x128xf32> to vector<1x128xf32>
    %29 = vector.broadcast %28 : vector<1x128xf32> to vector<8x128xf32>
    %30 = arith.addf %26, %29 : vector<8x128xf32>
    %cst_21 = arith.constant 0.00999999977 : f32
    %31 = vector.broadcast %cst_21 : f32 to vector<8x128xf32>
    %32 = arith.mulf %31, %30 : vector<8x128xf32>
    %33 = arith.maximumf %30, %32 : vector<8x128xf32>
    %c0_22 = arith.constant 0 : index
    %c0_23 = arith.constant 0 : index
    %34 = vector.load %arg4[%c0_22, %c0_23] : memref<8x128xf32, #tpu.memory_space<vmem>>, vector<8x128xf32>
    tpu.vector_store %arg4[%c0_22, %c0_23], %33 {strides = array<i32>} : memref<8x128xf32, #tpu.memory_space<vmem>>, vector<8x128xf32>,
    return
  }
  func.func @transform_0(%arg0: i32) -> (i32, i32) {
    %c0_i32 = arith.constant 0 : i32
    %c0_i32_0 = arith.constant 0 : i32
    return %arg0, %c0_i32 : i32, i32
  }
  func.func @transform_1(%arg0: i32) -> (i32, i32, i32) {
    %c0_i32 = arith.constant 0 : i32
    %c0_i32_0 = arith.constant 0 : i32
    %c0_i32_1 = arith.constant 0 : i32
    %c0_i32_2 = arith.constant 0 : i32
    return %c0_i32, %c0_i32_0, %c0_i32_1 : i32, i32, i32
  }
  func.func @transform_2(%arg0: i32) -> (i32, i32, i32) {
    %c0_i32 = arith.constant 0 : i32
    %c0_i32_0 = arith.constant 0 : i32
    %c0_i32_1 = arith.constant 0 : i32
    %c0_i32_2 = arith.constant 0 : i32
    return %c0_i32, %c0_i32_0, %c0_i32_1 : i32, i32, i32
  }
  func.func @transform_3(%arg0: i32) -> (i32, i32) {
    %c0_i32 = arith.constant 0 : i32
    %c0_i32_0 = arith.constant 0 : i32
    return %arg0, %c0_i32 : i32, i32
  }
}

module attributes {stable_mosaic.version = 11 : i64} {
  func.func @_fused_mlp_kernel(%arg0: i32, %arg1: memref<8x128xbf16, #tpu.memory_space<vmem>>, %arg2: memref<3x128x128xbf16, #tpu.memory_space<vmem>>, %arg3: memref<3x1x128xf32, #tpu.memory_space<vmem>>, %arg4: memref<8x128xf32, #tpu.memory_space<vmem>>) attributes {dimension_semantics = [#tpu.dimension_semantics<parallel>], iteration_bounds = array<i64: 1>, scalar_prefetch = 0 : i64, scratch_operands = 0 : i64, tpu.core_type = #tpu.core_type<tc>, window_params = [{transform_indices = @transform_0, window_bounds = array<i64: 8, 128>}, {pipeline_mode = #tpu.pipeline_mode<synchronous>, transform_indices = @transform_1, window_bounds = array<i64: 3, 128, 128>}, {pipeline_mode = #tpu.pipeline_mode<synchronous>, transform_indices = @transform_2, window_bounds = array<i64: 3, 1, 128>}, {transform_indices = @transform_3, window_bounds = array<i64: 8, 128>}]} {
    %c0 = arith.constant 0 : index
    %c0_0 = arith.constant 0 : index
    %0 = vector.load %arg1[%c0, %c0_0] : memref<8x128xbf16, #tpu.memory_space<vmem>>, vector<8x128xbf16>
    %c0_1 = arith.constant 0 : index
    %c0_2 = arith.constant 0 : index
    %c0_3 = arith.constant 0 : index
    %1 = vector.load %arg2[%c0_1, %c0_2, %c0_3] : memref<3x128x128xbf16, #tpu.memory_space<vmem>>, vector<1x128x128xbf16>
    %2 = vector.shape_cast %1 : vector<1x128x128xbf16> to vector<128x128xbf16>
    %cst = arith.constant dense<0.000000e+00> : vector<8x128xf32>
    %3 = tpu.matmul %0, %2, %cst {dimension_numbers = #tpu.dot_dimension_numbers<[1], [0], [0], [1], [0, 0, 1, 1], [], []>} : vector<8x128xbf16>, vector<128x128xbf16>, vector<8x128xf32> -> vector<8x128xf32>
    %c0_4 = arith.constant 0 : index
    %c0_5 = arith.constant 0 : index
    %c0_6 = arith.constant 0 : index
    %4 = vector.load %arg3[%c0_4, %c0_5, %c0_6] : memref<3x1x128xf32, #tpu.memory_space<vmem>>, vector<1x1x128xf32>
    %5 = vector.shape_cast %4 : vector<1x1x128xf32> to vector<1x128xf32>
    %6 = vector.broadcast %5 : vector<1x128xf32> to vector<8x128xf32>
    %7 = arith.addf %3, %6 : vector<8x128xf32>
    %cst_7 = arith.constant 0.00999999977 : f32
    %8 = vector.broadcast %cst_7 : f32 to vector<8x128xf32>
    %9 = arith.mulf %8, %7 : vector<8x128xf32>
    %10 = arith.maximumf %7, %9 : vector<8x128xf32>
    %11 = arith.truncf %10 : vector<8x128xf32> to vector<8x128xbf16>
    %c1 = arith.constant 1 : index
    %c0_8 = arith.constant 0 : index
    %c0_9 = arith.constant 0 : index
    %12 = vector.load %arg2[%c1, %c0_8, %c0_9] : memref<3x128x128xbf16, #tpu.memory_space<vmem>>, vector<1x128x128xbf16>
    %13 = vector.shape_cast %12 : vector<1x128x128xbf16> to vector<128x128xbf16>
    %cst_10 = arith.constant dense<0.000000e+00> : vector<8x128xf32>
    %14 = tpu.matmul %11, %13, %cst_10 {dimension_numbers = #tpu.dot_dimension_numbers<[1], [0], [0], [1], [0, 0, 1, 1], [], []>} : vector<8x128xbf16>, vector<128x128xbf16>, vector<8x128xf32> -> vector<8x128xf32>
    %c1_11 = arith.constant 1 : index
    %c0_12 = arith.constant 0 : index
    %c0_13 = arith.constant 0 : index
    %15 = vector.load %arg3[%c1_11, %c0_12, %c0_13] : memref<3x1x128xf32, #tpu.memory_space<vmem>>, vector<1x1x128xf32>
    %16 = vector.shape_cast %15 : vector<1x1x128xf32> to vector<1x128xf32>
    %17 = vector.broadcast %16 : vector<1x128xf32> to vector<8x128xf32>
    %18 = arith.addf %14, %17 : vector<8x128xf32>
    %cst_14 = arith.constant 0.00999999977 : f32
    %19 = vector.broadcast %cst_14 : f32 to vector<8x128xf32>
    %20 = arith.mulf %19, %18 : vector<8x128xf32>
    %21 = arith.maximumf %18, %20 : vector<8x128xf32>
    %22 = arith.addf %21, %10 : vector<8x128xf32>
    %23 = arith.truncf %22 : vector<8x128xf32> to vector<8x128xbf16>
    %c2 = arith.constant 2 : index
    %c0_15 = arith.constant 0 : index
    %c0_16 = arith.constant 0 : index
    %24 = vector.load %arg2[%c2, %c0_15, %c0_16] : memref<3x128x128xbf16, #tpu.memory_space<vmem>>, vector<1x128x128xbf16>
    %25 = vector.shape_cast %24 : vector<1x128x128xbf16> to vector<128x128xbf16>
    %cst_17 = arith.constant dense<0.000000e+00> : vector<8x128xf32>
    %26 = tpu.matmul %23, %25, %cst_17 {dimension_numbers = #tpu.dot_dimension_numbers<[1], [0], [0], [1], [0, 0, 1, 1], [], []>} : vector<8x128xbf16>, vector<128x128xbf16>, vector<8x128xf32> -> vector<8x128xf32>
    %c2_18 = arith.constant 2 : index
    %c0_19 = arith.constant 0 : index
    %c0_20 = arith.constant 0 : index
    %27 = vector.load %arg3[%c2_18, %c0_19, %c0_20] : memref<3x1x128xf32, #tpu.memory_space<vmem>>, vector<1x1x128xf32>
    %28 = vector.shape_cast %27 : vector<1x1x128xf32> to vector<1x128xf32>
    %29 = vector.broadcast %28 : vector<1x128xf32> to vector<8x128xf32>
    %30 = arith.addf %26, %29 : vector<8x128xf32>
    %cst_21 = arith.constant 0.00999999977 : f32
    %31 = vector.broadcast %cst_21 : f32 to vector<8x128xf32>
    %32 = arith.mulf %31, %30 : vector<8x128xf32>
    %33 = arith.maximumf %30, %32 : vector<8x128xf32>
    %c0_22 = arith.constant 0 : index
    %c0_23 = arith.constant 0 : index
    %34 = vector.load %arg4[%c0_22, %c0_23] : memref<8x128xf32, #tpu.memory_space<vmem>>, vector<8x128xf32>
    tpu.vector_store %arg4[%c0_22, %c0_23], %33 {strides = array<i32>} : memref<8x128xf32, #tpu.memory_space<vmem>>, vector<8x128xf32>,
    return
  }
  func.func @transform_0(%arg0: i32) -> (i32, i32) {
    %c0_i32 = arith.constant 0 : i32
    %c0_i32_0 = arith.constant 0 : i32
    return %arg0, %c0_i32 : i32, i32
  }
  func.func @transform_1(%arg0: i32) -> (i32, i32, i32) {
    %c0_i32 = arith.constant 0 : i32
    %c0_i32_0 = arith.constant 0 : i32
    %c0_i32_1 = arith.constant 0 : i32
    %c0_i32_2 = arith.constant 0 : i32
    return %c0_i32, %c0_i32_0, %c0_i32_1 : i32, i32, i32
  }
  func.func @transform_2(%arg0: i32) -> (i32, i32, i32) {
    %c0_i32 = arith.constant 0 : i32
    %c0_i32_0 = arith.constant 0 : i32
    %c0_i32_1 = arith.constant 0 : i32
    %c0_i32_2 = arith.constant 0 : i32
    return %c0_i32, %c0_i32_0, %c0_i32_1 : i32, i32, i32
  }
  func.func @transform_3(%arg0: i32) -> (i32, i32) {
    %c0_i32 = arith.constant 0 : i32
    %c0_i32_0 = arith.constant 0 : i32
    return %arg0, %c0_i32 : i32, i32
  }
}

</mosaic_0001>

<bundles_post_ra>
// kernel: tpu_custom_call.1
= control target key start
LH: loop header
LB: loop body
LE: loop exit
PB: predicated region body
PF: predicated region fallthrough
CT: control target
= control target key end

     0   :  { %8 = vsyncpa [#allocation3], 0  ;;  %s609_s0 = inlined_call_operand.hbm [shape: bf16[8,128], index: 0, kind: input, shape index: {}]   ;;  %s610_s1 = inlined_call_operand.hbm [shape: bf16[3,128,128], index: 1, kind: input, shape index: {}]   ;;  %s611_s2 = inlined_call_operand.hbm [shape: f32[3,1,128], index: 2, kind: input, shape index: {}]   ;;  %s612_s3 = inlined_call_operand.hbm [shape: f32[8,128], index: 3, kind: output, shape index: {}]  }
   0x1   :  { %9 = vsyncpa [#allocation6], 0  ;;  %s26_s14 = sshll.u32 %s610_s1, 4  ;;  %s27_s14 = int_to_ptr.hbm [resolvable:$true] %s26_s14 }
   0x2   :  { %10 = vsyncpa [#allocation4], 0  ;;  %s569_s15 = smov [#allocation5]   ;;  %s16_s19 = sshll.u32 %s609_s0, 4  ;;  %s17_s19 = int_to_ptr.hbm [resolvable:$true] %s16_s19 }
   0x3   :  { %s28_s16 = sshll.u32 %s569_s15, 4  ;;  %s570_s20 = smov 64   ;;  %s29_s16 = int_to_ptr.vmem [resolvable:$true] %s28_s16 }
   0x4   :  { %s571_s21 = smov 4   ;;  %s572_s22 = smov [#allocation2]  }
   0x5   :  { %34 = dma.hbm_to_vmem [thread:$0]  %s27_s14, 3072, %s29_s16, [#allocation6], %s570_s20, %s570_s20, %s571_s21  }
   0x6   :  { %s18_s23 = sshll.u32 %s572_s22, 4  ;;  %s39_s26 = sshll.u32 %s611_s2, 4  ;;  %s19_s23 = int_to_ptr.vmem [resolvable:$true] %s18_s23  ;;  %s40_s26 = int_to_ptr.hbm [resolvable:$true] %s39_s26 }
   0x7   :  { %21 = dma.hbm_to_vmem [thread:$0]  %s17_s19, 64, %s19_s23, [#allocation3]  }
   0x8   :  { %s573_s1 = smov [#allocation7]   ;;  %s574_s28 = smov 16  }
   0x9   :  { %s41_s27 = sshll.u32 %s573_s1, 4  ;;  %s575_s29 = smov 1   ;;  %s42_s27 = int_to_ptr.vmem [resolvable:$true] %s41_s27 }
   0xa   :  { %47 = dma.hbm_to_vmem [thread:$0]  %s40_s26, 48, %s42_s27, [#allocation6], %s574_s28, %s574_s28, %s575_s29  }
   0xb   :  { %563 = dma.done.wait [#allocation3], 64  }
   0xc   :  { %564 = vsyncadd [#allocation3], 4294967232 }
   0xd   :  { %565 = dma.done.wait [#allocation6], 3120  }
   0xe   :  { %566 = vsyncadd [#allocation6], 4294964176  ;;  %v439_v0 = vld [vmem:[#allocation5 + $0x38] sm:$0xff]  ;;  %v438_v1 = vld [vmem:[#allocation5 + $0x30] sm:$0xff]  ;;  %s576_s0 = smov [#allocation8]   ;;  %s325_s5 = sshll.u32 %s612_s3, 4  ;;  %s326_s5 = int_to_ptr.hbm [resolvable:$true] %s325_s5 }
   0xf   :  { %129 = vmatpush.bf16.msra.mxu0 %v439_v0  ;;  %v447_v2 = vld [vmem:[#allocation5 + $0x78] sm:$0xff]  ;;  %v446_v3 = vld [vmem:[#allocation5 + $0x70] sm:$0xff]  ;;  %v437_v4 = vld [vmem:[#allocation5 + $0x28] sm:$0xff]  ;;  %s323_s2 = sshll.u32 %s576_s0, 4  ;;  %s324_s2 = int_to_ptr.vmem [resolvable:$true] %s323_s2 }
  0x10   :  { %215 = vmatpush.bf16.msra.mxu1 %v447_v2  ;;  %v445_v5 = vld [vmem:[#allocation5 + $0x68] sm:$0xff]  ;;  %v436_v6 = vld [vmem:[#allocation5 + $0x20] sm:$0xff]  ;;  %v435_v8 = vld [vmem:[#allocation5 + $0x18] sm:$0xff] }
  0x11   :  { %v444_v7 = vld [vmem:[#allocation5 + $0x60] sm:$0xff]  ;;  %v443_v9 = vld [vmem:[#allocation5 + $0x58] sm:$0xff]  ;;  %v434_v10 = vld [vmem:[#allocation5 + $0x10] sm:$0xff] }
  0x12   :  { %v442_v11 = vld [vmem:[#allocation5 + $0x50] sm:$0xff]  ;;  %v433_v12 = vld [vmem:[#allocation5 + $0x8] sm:$0xff]  ;;  %v432_v13 = vld [vmem:[#allocation5] sm:$0xff] }
  0x13   :  { %130 = vmatpush.bf16.msra.mxu0 %v438_v1  ;;  %v60_v14 = vld [vmem:[#allocation2] sm:$0xf]  ;;  %v441_v15 = vld [vmem:[#allocation5 + $0x48] sm:$0xff]  ;;  %v440_v16 = vld [vmem:[#allocation5 + $0x40] sm:$0xff] }
  0x14   :  { %216 = vmatpush.bf16.msra.mxu1 %v446_v3  ;;  %v455_v17 = vld [vmem:[#allocation5 + $0xb8] sm:$0xff]  ;;  %v454_v18 = vld [vmem:[#allocation5 + $0xb0] sm:$0xff]  ;;  %v453_v19 = vld [vmem:[#allocation5 + $0xa8] sm:$0xff] }
  0x15   :  { %302 = vmatpush.bf16.msra.mxu2 %v455_v17  ;;  %v452_v20 = vld [vmem:[#allocation5 + $0xa0] sm:$0xff]  ;;  %v451_v21 = vld [vmem:[#allocation5 + $0x98] sm:$0xff]  ;;  %v450_v29 = vld [vmem:[#allocation5 + $0x90] sm:$0xff] }
  0x16   :  { %v464_v22 = vld [vmem:[#allocation7] ss:$0 sm:$0xff]  ;;  %v449_v30 = vld [vmem:[#allocation5 + $0x88] sm:$0xff]  ;;  %v465_v32 = vld [vmem:[#allocation7 + $0x1] ss:$0 sm:$0xff] }
  0x17   :  { %131 = vmatpush.bf16.msra.mxu0 %v437_v4  ;;  %v448_v31 = vld [vmem:[#allocation5 + $0x80] sm:$0xff] }
  0x18   :  { %217 = vmatpush.bf16.msra.mxu1 %v445_v5  ;;  %v466_v40 = vld [vmem:[#allocation7 + $0x2] ss:$0 sm:$0xff] }
  0x19   :  { %303 = vmatpush.bf16.msra.mxu2 %v454_v18 }
  0x1b   :  { %132 = vmatpush.bf16.msra.mxu0 %v436_v6 }
  0x1c   :  { %218 = vmatpush.bf16.msra.mxu1 %v444_v7 }
  0x1d   :  { %304 = vmatpush.bf16.msra.mxu2 %v453_v19 }
  0x1f   :  { %133 = vmatpush.bf16.msra.mxu0 %v435_v8 }
  0x20   :  { %219 = vmatpush.bf16.msra.mxu1 %v443_v9 }
  0x21   :  { %305 = vmatpush.bf16.msra.mxu2 %v452_v20 }
  0x23   :  { %134 = vmatpush.bf16.msra.mxu0 %v434_v10 }
  0x24   :  { %220 = vmatpush.bf16.msra.mxu1 %v442_v11 }
  0x25   :  { %306 = vmatpush.bf16.msra.mxu2 %v451_v21 }
  0x27   :  { %135 = vmatpush.bf16.msra.mxu0 %v433_v12 }
  0x28   :  { %221 = vmatpush.bf16.msra.mxu1 %v441_v15 }
  0x29   :  { %307 = vmatpush.bf16.msra.mxu2 %v450_v29 }
  0x2b   :  { %136 = vmatpush.bf16.msra.mxu0 %v432_v13 }
  0x2c   :  { %222 = vmatpush.bf16.msra.mxu1 %v440_v16 }
  0x2d   :  { %308 = vmatpush.bf16.msra.mxu2 %v449_v30 }
  0x2e   :  { %137 = vmatmul.bf16.vlgmr.msra.gmra.mxu0 %v60_v14 }
  0x31   :  { %309 = vmatpush.bf16.msra.mxu2 %v448_v31 }
  0xab   :  { %v138_v23 = vpop.f32.mrf.mxu0 }
  0xac   :  { %v139_v24 = vadd.f32 %v464_v22, %v138_v23 }
  0xae   :  { %v142_v25 = vmul.f32 0.01, %v139_v24 }
  0xb0   :  { %v143_v26 = vmax.f32 %v139_v24, %v142_v25 }
  0xb2   :  { %v144_v27 = vpack.c.bf16 %v143_v26, %v143_v26 }
  0xb3   :  { %v140_v28 = vpop.f32.mrf.mxu0 }
  0xb4   :  { %223 = vmatmul.bf16.vlgmr.msra.gmra.mxu1 %v144_v27 }
 0x131   :  { %v224_v33 = vpop.f32.mrf.mxu1 }
 0x132   :  { %v225_v34 = vadd.f32 %v465_v32, %v224_v33 }
 0x134   :  { %v228_v35 = vmul.f32 0.01, %v225_v34 }
 0x136   :  { %v229_v36 = vmax.f32 %v225_v34, %v228_v35 }
 0x138   :  { %v230_v37 = vadd.f32 %v229_v36, %v143_v26 }
 0x139   :  { %v226_v38 = vpop.f32.mrf.mxu1 }
 0x13a   :  { %v231_v39 = vpack.c.bf16 %v230_v37, %v230_v37 }
 0x13c   :  { %310 = vmatmul.bf16.vlgmr.msra.gmra.mxu2 %v231_v39 }
 0x1bf   :  { %v311_v41 = vpop.f32.mrf.mxu2 }
 0x1c0   :  { %v312_v42 = vadd.f32 %v466_v40, %v311_v41 }
 0x1c2   :  { %v315_v43 = vmul.f32 0.01, %v312_v42 }
 0x1c4   :  { %v316_v44 = vmax.f32 %v312_v42, %v315_v43 }
 0x1c6   :  { %317 = vst [vmem:[#allocation8] sm:$0xff] %v316_v44 }
 0x1c7   :  { %v313_v45 = vpop.f32.mrf.mxu2  ;;  %328 = dma.vmem_to_hbm [thread:$0]  %s324_s2, 128, %s326_s5, [#allocation4]  }
 0x1c8   :  { %567 = dma.done.wait [#allocation4], 128  }
 0x1c9   :  { %568 = vsyncadd [#allocation4], 4294967168 }
 0x1ca   :  { %333 = vsyncpa [#allocation3], 1 }
 0x1cb   :  { %334 = vsyncpa [#allocation6], 1 }
 0x1cc   :  { %335 = vsyncpa [#allocation4], 1 }

// kernel: tpu_custom_call.1
= control target key start
LH: loop header
LB: loop body
LE: loop exit
PB: predicated region body
PF: predicated region fallthrough
CT: control target
= control target key end

     0   :  { %8 = vsyncpa [#allocation3], 0  ;;  %s609_s0 = inlined_call_operand.hbm [shape: bf16[8,128], index: 0, kind: input, shape index: {}]   ;;  %s610_s1 = inlined_call_operand.hbm [shape: bf16[3,128,128], index: 1, kind: input, shape index: {}]   ;;  %s611_s2 = inlined_call_operand.hbm [shape: f32[3,1,128], index: 2, kind: input, shape index: {}]   ;;  %s612_s3 = inlined_call_operand.hbm [shape: f32[8,128], index: 3, kind: output, shape index: {}]  }
   0x1   :  { %9 = vsyncpa [#allocation6], 0  ;;  %s26_s14 = sshll.u32 %s610_s1, 4  ;;  %s27_s14 = int_to_ptr.hbm [resolvable:$true] %s26_s14 }
   0x2   :  { %10 = vsyncpa [#allocation4], 0  ;;  %s569_s15 = smov [#allocation5]   ;;  %s16_s19 = sshll.u32 %s609_s0, 4  ;;  %s17_s19 = int_to_ptr.hbm [resolvable:$true] %s16_s19 }
   0x3   :  { %s28_s16 = sshll.u32 %s569_s15, 4  ;;  %s570_s20 = smov 64   ;;  %s29_s16 = int_to_ptr.vmem [resolvable:$true] %s28_s16 }
   0x4   :  { %s571_s21 = smov 4   ;;  %s572_s22 = smov [#allocation2]  }
   0x5   :  { %34 = dma.hbm_to_vmem [thread:$0]  %s27_s14, 3072, %s29_s16, [#allocation6], %s570_s20, %s570_s20, %s571_s21  }
   0x6   :  { %s18_s23 = sshll.u32 %s572_s22, 4  ;;  %s39_s26 = sshll.u32 %s611_s2, 4  ;;  %s19_s23 = int_to_ptr.vmem [resolvable:$true] %s18_s23  ;;  %s40_s26 = int_to_ptr.hbm [resolvable:$true] %s39_s26 }
   0x7   :  { %21 = dma.hbm_to_vmem [thread:$0]  %s17_s19, 64, %s19_s23, [#allocation3]  }
   0x8   :  { %s573_s1 = smov [#allocation7]   ;;  %s574_s28 = smov 16  }
   0x9   :  { %s41_s27 = sshll.u32 %s573_s1, 4  ;;  %s575_s29 = smov 1   ;;  %s42_s27 = int_to_ptr.vmem [resolvable:$true] %s41_s27 }
   0xa   :  { %47 = dma.hbm_to_vmem [thread:$0]  %s40_s26, 48, %s42_s27, [#allocation6], %s574_s28, %s574_s28, %s575_s29  }
   0xb   :  { %563 = dma.done.wait [#allocation3], 64  }
   0xc   :  { %564 = vsyncadd [#allocation3], 4294967232 }
   0xd   :  { %565 = dma.done.wait [#allocation6], 3120  }
   0xe   :  { %566 = vsyncadd [#allocation6], 4294964176  ;;  %v439_v0 = vld [vmem:[#allocation5 + $0x38] sm:$0xff]  ;;  %v438_v1 = vld [vmem:[#allocation5 + $0x30] sm:$0xff]  ;;  %s576_s0 = smov [#allocation8]   ;;  %s325_s5 = sshll.u32 %s612_s3, 4  ;;  %s326_s5 = int_to_ptr.hbm [resolvable:$true] %s325_s5 }
   0xf   :  { %129 = vmatpush.bf16.msra.mxu0 %v439_v0  ;;  %v447_v2 = vld [vmem:[#allocation5 + $0x78] sm:$0xff]  ;;  %v446_v3 = vld [vmem:[#allocation5 + $0x70] sm:$0xff]  ;;  %v437_v4 = vld [vmem:[#allocation5 + $0x28] sm:$0xff]  ;;  %s323_s2 = sshll.u32 %s576_s0, 4  ;;  %s324_s2 = int_to_ptr.vmem [resolvable:$true] %s323_s2 }
  0x10   :  { %215 = vmatpush.bf16.msra.mxu1 %v447_v2  ;;  %v445_v5 = vld [vmem:[#allocation5 + $0x68] sm:$0xff]  ;;  %v436_v6 = vld [vmem:[#allocation5 + $0x20] sm:$0xff]  ;;  %v435_v8 = vld [vmem:[#allocation5 + $0x18] sm:$0xff] }
  0x11   :  { %v444_v7 = vld [vmem:[#allocation5 + $0x60] sm:$0xff]  ;;  %v443_v9 = vld [vmem:[#allocation5 + $0x58] sm:$0xff]  ;;  %v434_v10 = vld [vmem:[#allocation5 + $0x10] sm:$0xff] }
  0x12   :  { %v442_v11 = vld [vmem:[#allocation5 + $0x50] sm:$0xff]  ;;  %v433_v12 = vld [vmem:[#allocation5 + $0x8] sm:$0xff]  ;;  %v432_v13 = vld [vmem:[#allocation5] sm:$0xff] }
  0x13   :  { %130 = vmatpush.bf16.msra.mxu0 %v438_v1  ;;  %v60_v14 = vld [vmem:[#allocation2] sm:$0xf]  ;;  %v441_v15 = vld [vmem:[#allocation5 + $0x48] sm:$0xff]  ;;  %v440_v16 = vld [vmem:[#allocation5 + $0x40] sm:$0xff] }
  0x14   :  { %216 = vmatpush.bf16.msra.mxu1 %v446_v3  ;;  %v455_v17 = vld [vmem:[#allocation5 + $0xb8] sm:$0xff]  ;;  %v454_v18 = vld [vmem:[#allocation5 + $0xb0] sm:$0xff]  ;;  %v453_v19 = vld [vmem:[#allocation5 + $0xa8] sm:$0xff] }
  0x15   :  { %302 = vmatpush.bf16.msra.mxu2 %v455_v17  ;;  %v452_v20 = vld [vmem:[#allocation5 + $0xa0] sm:$0xff]  ;;  %v451_v21 = vld [vmem:[#allocation5 + $0x98] sm:$0xff]  ;;  %v450_v29 = vld [vmem:[#allocation5 + $0x90] sm:$0xff] }
  0x16   :  { %v464_v22 = vld [vmem:[#allocation7] ss:$0 sm:$0xff]  ;;  %v449_v30 = vld [vmem:[#allocation5 + $0x88] sm:$0xff]  ;;  %v465_v32 = vld [vmem:[#allocation7 + $0x1] ss:$0 sm:$0xff] }
  0x17   :  { %131 = vmatpush.bf16.msra.mxu0 %v437_v4  ;;  %v448_v31 = vld [vmem:[#allocation5 + $0x80] sm:$0xff] }
  0x18   :  { %217 = vmatpush.bf16.msra.mxu1 %v445_v5  ;;  %v466_v40 = vld [vmem:[#allocation7 + $0x2] ss:$0 sm:$0xff] }
  0x19   :  { %303 = vmatpush.bf16.msra.mxu2 %v454_v18 }
  0x1b   :  { %132 = vmatpush.bf16.msra.mxu0 %v436_v6 }
  0x1c   :  { %218 = vmatpush.bf16.msra.mxu1 %v444_v7 }
  0x1d   :  { %304 = vmatpush.bf16.msra.mxu2 %v453_v19 }
  0x1f   :  { %133 = vmatpush.bf16.msra.mxu0 %v435_v8 }
  0x20   :  { %219 = vmatpush.bf16.msra.mxu1 %v443_v9 }
  0x21   :  { %305 = vmatpush.bf16.msra.mxu2 %v452_v20 }
  0x23   :  { %134 = vmatpush.bf16.msra.mxu0 %v434_v10 }
  0x24   :  { %220 = vmatpush.bf16.msra.mxu1 %v442_v11 }
  0x25   :  { %306 = vmatpush.bf16.msra.mxu2 %v451_v21 }
  0x27   :  { %135 = vmatpush.bf16.msra.mxu0 %v433_v12 }
  0x28   :  { %221 = vmatpush.bf16.msra.mxu1 %v441_v15 }
  0x29   :  { %307 = vmatpush.bf16.msra.mxu2 %v450_v29 }
  0x2b   :  { %136 = vmatpush.bf16.msra.mxu0 %v432_v13 }
  0x2c   :  { %222 = vmatpush.bf16.msra.mxu1 %v440_v16 }
  0x2d   :  { %308 = vmatpush.bf16.msra.mxu2 %v449_v30 }
  0x2e   :  { %137 = vmatmul.bf16.vlgmr.msra.gmra.mxu0 %v60_v14 }
  0x31   :  { %309 = vmatpush.bf16.msra.mxu2 %v448_v31 }
  0xab   :  { %v138_v23 = vpop.f32.mrf.mxu0 }
  0xac   :  { %v139_v24 = vadd.f32 %v464_v22, %v138_v23 }
  0xae   :  { %v142_v25 = vmul.f32 0.01, %v139_v24 }
  0xb0   :  { %v143_v26 = vmax.f32 %v139_v24, %v142_v25 }
  0xb2   :  { %v144_v27 = vpack.c.bf16 %v143_v26, %v143_v26 }
  0xb3   :  { %v140_v28 = vpop.f32.mrf.mxu0 }
  0xb4   :  { %223 = vmatmul.bf16.vlgmr.msra.gmra.mxu1 %v144_v27 }
 0x131   :  { %v224_v33 = vpop.f32.mrf.mxu1 }
 0x132   :  { %v225_v34 = vadd.f32 %v465_v32, %v224_v33 }
 0x134   :  { %v228_v35 = vmul.f32 0.01, %v225_v34 }
 0x136   :  { %v229_v36 = vmax.f32 %v225_v34, %v228_v35 }
 0x138   :  { %v230_v37 = vadd.f32 %v229_v36, %v143_v26 }
 0x139   :  { %v226_v38 = vpop.f32.mrf.mxu1 }
 0x13a   :  { %v231_v39 = vpack.c.bf16 %v230_v37, %v230_v37 }
 0x13c   :  { %310 = vmatmul.bf16.vlgmr.msra.gmra.mxu2 %v231_v39 }
 0x1bf   :  { %v311_v41 = vpop.f32.mrf.mxu2 }
 0x1c0   :  { %v312_v42 = vadd.f32 %v466_v40, %v311_v41 }
 0x1c2   :  { %v315_v43 = vmul.f32 0.01, %v312_v42 }
 0x1c4   :  { %v316_v44 = vmax.f32 %v312_v42, %v315_v43 }
 0x1c6   :  { %317 = vst [vmem:[#allocation8] sm:$0xff] %v316_v44 }
 0x1c7   :  { %v313_v45 = vpop.f32.mrf.mxu2  ;;  %328 = dma.vmem_to_hbm [thread:$0]  %s324_s2, 128, %s326_s5, [#allocation4]  }
 0x1c8   :  { %567 = dma.done.wait [#allocation4], 128  }
 0x1c9   :  { %568 = vsyncadd [#allocation4], 4294967168 }
 0x1ca   :  { %333 = vsyncpa [#allocation3], 1 }
 0x1cb   :  { %334 = vsyncpa [#allocation6], 1 }
 0x1cc   :  { %335 = vsyncpa [#allocation4], 1 }

</bundles_post_ra>
